<compile_context>
chip_gen: v5e
topology: v5e:2x2
jax: 0.10.0
libtpu: 0.0.40
codegen_flags: <defaults>
</compile_context>

<pallas_src>
import functools

import jax
import jax.numpy as jnp
from jax import lax
from jax.experimental import pallas as pl
from jax.experimental.pallas import tpu as pltpu


def _sampler_kernel(feat_ref, grid_ref, out_ref, acc_ref, *,
                    h_in, w_in, hw_chunk, num_chunks, compute_dtype):
    # feat_ref: (1, C_pad, HW_pad)   grid_ref: (1, 2, P_tile)
    # out_ref:  (1, C_pad, P_tile)   acc_ref:  (C_pad, P_tile) f32 scratch
    g = grid_ref[0].astype(jnp.float32)            # (2, P)
    x = g[0:1, :]                                  # (1, P) lane-dense
    y = g[1:2, :]                                  # (1, P)

    # Un-normalize (align_corners=False, the F.grid_sample default).
    ix = ((x + 1.0) * w_in - 1.0) * 0.5
    iy = ((y + 1.0) * h_in - 1.0) * 0.5

    x0f = jnp.floor(ix)
    y0f = jnp.floor(iy)
    tx = ix - x0f                                  # fractional weights
    ty = iy - y0f
    x0 = x0f.astype(jnp.int32)
    y0 = y0f.astype(jnp.int32)
    x1 = x0 + 1
    y1 = y0 + 1

    vx0 = (x0 >= 0) & (x0 < w_in)
    vx1 = (x1 >= 0) & (x1 < w_in)
    vy0 = (y0 >= 0) & (y0 < h_in)
    vy1 = (y1 >= 0) & (y1 < h_in)

    # padding_mode='zeros': invalid corners get weight 0 (cheap (1, P) rows).
    zero = jnp.zeros_like(tx)
    w00 = jnp.where(vx0 & vy0, (1.0 - tx) * (1.0 - ty), zero).astype(compute_dtype)
    w10 = jnp.where(vx1 & vy0, tx * (1.0 - ty), zero).astype(compute_dtype)
    w01 = jnp.where(vx0 & vy1, (1.0 - tx) * ty, zero).astype(compute_dtype)
    w11 = jnp.where(vx1 & vy1, tx * ty, zero).astype(compute_dtype)

    # Flattened feature indices of the four corners (linear in dx, dy).
    idx00 = y0 * w_in + x0
    idx10 = idx00 + 1
    idx01 = idx00 + w_in
    idx11 = idx00 + w_in + 1

    acc_ref[...] = jnp.zeros_like(acc_ref)

    def chunk_body(c, carry):
        base = pl.multiple_of(c * hw_chunk, 128)
        # Row indices covered by this HW chunk, on the sublane axis.
        row = base + lax.broadcasted_iota(jnp.int32, (hw_chunk, 1), 0)
        # Transposed (HW_chunk, P) interpolation matrix: one fused compare+select
        # per corner (weights are already validity-gated above).
        wmat = (jnp.where(idx00 == row, w00, 0.0)
                + jnp.where(idx10 == row, w10, 0.0)
                + jnp.where(idx01 == row, w01, 0.0)
                + jnp.where(idx11 == row, w11, 0.0))      # (HW_chunk, P)
        fchunk = feat_ref[0, :, pl.ds(base, hw_chunk)].astype(compute_dtype)
        # (C, HW_chunk) x (HW_chunk, P) -> (C, P): plain matmul, f32 accumulate.
        acc_ref[...] += jnp.dot(fchunk, wmat, preferred_element_type=jnp.float32)
        return carry

    lax.fori_loop(0, num_chunks, chunk_body, 0)

    out_ref[0] = acc_ref[...].astype(out_ref.dtype)


def _round_up(v: int, m: int) -> int:
    return ((v + m - 1) // m) * m


def grid_sample_bilinear_zeros(input_features, grid, *,
                               p_tile=256, hw_chunk=512,
                               compute_dtype=jnp.float32):
    """F.grid_sample(bilinear, zeros, align_corners=False) as a Pallas TPU kernel."""
    N, C, H_in, W_in = input_features.shape
    gN, H_out, W_out, two = grid.shape
    assert gN == N and two == 2

    HW = H_in * W_in
    P = H_out * W_out

    # Lane/sublane friendly padding: C -> x8, HW & P -> x128.
    c_pad = _round_up(C, 8)
    p_tile = min(_round_up(p_tile, 128), _round_up(P, 128))
    p_pad = _round_up(P, p_tile)
    n_p_tiles = p_pad // p_tile
    hw_chunk = min(_round_up(hw_chunk, 128), _round_up(HW, 128))
    hw_pad = _round_up(HW, hw_chunk)
    num_chunks = hw_pad // hw_chunk

    feat = input_features.reshape(N, C, HW)
    feat = jnp.pad(feat, ((0, 0), (0, c_pad - C), (0, hw_pad - HW)))

    # (N, 2, P_pad): x / y as lane-dense rows.
    coords = jnp.transpose(grid.reshape(N, P, 2), (0, 2, 1))
    coords = jnp.pad(coords, ((0, 0), (0, 0), (0, p_pad - P)))

    kernel = functools.partial(
        _sampler_kernel, h_in=H_in, w_in=W_in, hw_chunk=hw_chunk,
        num_chunks=num_chunks, compute_dtype=compute_dtype)

    out = pl.pallas_call(
        kernel,
        out_shape=jax.ShapeDtypeStruct((N, c_pad, p_pad), input_features.dtype),
        grid_spec=pltpu.PrefetchScalarGridSpec(
            num_scalar_prefetch=0,
            grid=(N, n_p_tiles),
            in_specs=[
                # Feature block index is invariant over the P-tile axis, so it
                # stays resident in VMEM (DMA skipped) while all P-tiles of
                # batch element n are processed.
                pl.BlockSpec((1, c_pad, hw_pad), lambda n, p: (n, 0, 0)),
                pl.BlockSpec((1, 2, p_tile), lambda n, p: (n, 0, p)),
            ],
            out_specs=pl.BlockSpec((1, c_pad, p_tile), lambda n, p: (n, 0, p)),
            scratch_shapes=[pltpu.VMEM((c_pad, p_tile), jnp.float32)],
        ),
        compiler_params=pltpu.CompilerParams(
            dimension_semantics=("parallel", "parallel"),
            vmem_limit_bytes=32 * 1024 * 1024,
        ),
    )(feat, coords)

    return out[:, :C, :P].reshape(N, C, H_out, W_out)


class Sampler:
    """Pallas port of pcdet Sampler (grid_sample wrapper)."""

    def __init__(self, mode='bilinear', padding_mode='zeros'):
        self.mode = mode
        self.padding_mode = padding_mode

    def __call__(self, input_features, grid):
        # TODO(synk): only mode='bilinear' + padding_mode='zeros' (the module's
        # defaults) are implemented; nearest/border/reflection need other weights.
        assert self.mode == 'bilinear' and self.padding_mode == 'zeros'
        return grid_sample_bilinear_zeros(input_features, grid)


def _grid_sample_ref(feat, grid):
    """Pure-JAX reference (bilinear, zeros, align_corners=False)."""
    N, C, H, W = feat.shape
    x = grid[..., 0]
    y = grid[..., 1]
    ix = ((x + 1.0) * W - 1.0) * 0.5
    iy = ((y + 1.0) * H - 1.0) * 0.5
    x0 = jnp.floor(ix)
    y0 = jnp.floor(iy)
    tx = ix - x0
    ty = iy - y0
    x0i = x0.astype(jnp.int32)
    y0i = y0.astype(jnp.int32)

    def gather(fi, yi, xi):
        valid = (xi >= 0) & (xi < W) & (yi >= 0) & (yi < H)
        v = fi[:, jnp.clip(yi, 0, H - 1), jnp.clip(xi, 0, W - 1)]
        return jnp.where(valid[None], v, 0.0)

    def per_batch(fi, yi, xi, txb, tyb):
        w00 = (1 - txb) * (1 - tyb)
        w10 = txb * (1 - tyb)
        w01 = (1 - txb) * tyb
        w11 = txb * tyb
        return (gather(fi, yi, xi) * w00[None]
                + gather(fi, yi, xi + 1) * w10[None]
                + gather(fi, yi + 1, xi) * w01[None]
                + gather(fi, yi + 1, xi + 1) * w11[None])

    return jax.vmap(per_batch)(feat, y0i, x0i, tx, ty)


if __name__ == "__main__":
    key = jax.random.PRNGKey(0)
    k1, k2, k3, k4 = jax.random.split(key, 4)

    # Config 1: module-default-ish small shapes, default tiles.
    N, C, H_in, W_in = 2, 4, 16, 16
    H_out, W_out = 8, 8
    feat1 = jax.random.normal(k1, (N, C, H_in, W_in), dtype=jnp.float32)
    grid1 = jax.random.uniform(k2, (N, H_out, W_out, 2),
                               minval=-1.1, maxval=1.1, dtype=jnp.float32)
    sampler = Sampler(mode='bilinear', padding_mode='zeros')
    out1 = jax.block_until_ready(sampler(feat1, grid1))
    ref1 = _grid_sample_ref(feat1, grid1)
    assert out1.shape == (N, C, H_out, W_out)
    assert jnp.allclose(out1, ref1, atol=1e-5, rtol=1e-5), "config1 mismatch"

    # Config 2: odd C / non-x128 HW / multiple P tiles and HW chunks
    # (exercises padding, the HW reduction loop and P-tile parallelism).
    N2, C2, H2, W2 = 1, 5, 12, 20
    Ho2, Wo2 = 16, 16
    feat2 = jax.random.normal(k3, (N2, C2, H2, W2), dtype=jnp.float32)
    grid2 = jax.random.uniform(k4, (N2, Ho2, Wo2, 2),
                               minval=-1.2, maxval=1.2, dtype=jnp.float32)
    out2 = jax.block_until_ready(
        grid_sample_bilinear_zeros(feat2, grid2, p_tile=128, hw_chunk=128))
    ref2 = _grid_sample_ref(feat2, grid2)
    assert out2.shape == (N2, C2, Ho2, Wo2)
    assert jnp.allclose(out2, ref2, atol=1e-5, rtol=1e-5), "config2 mismatch"

    print("KERNEL_OK")
</pallas_src>

<mosaic_0001>
module attributes {stable_mosaic.version = 11 : i64} {
  func.func @_sampler_kernel(%arg0: i32, %arg1: i32, %arg2: memref<1x8x256xf32, #tpu.memory_space<vmem>>, %arg3: memref<1x2x128xf32, #tpu.memory_space<vmem>>, %arg4: memref<1x8x128xf32, #tpu.memory_space<vmem>>, %arg5: memref<8x128xf32, #tpu.memory_space<vmem>>) attributes {dimension_semantics = [#tpu.dimension_semantics<parallel>, #tpu.dimension_semantics<parallel>], iteration_bounds = array<i64: 2, 1>, scalar_prefetch = 0 : i64, scratch_operands = 1 : i64, tpu.core_type = #tpu.core_type<tc>, window_params = [{transform_indices = @transform_0, window_bounds = array<i64: 1, 8, 256>}, {transform_indices = @transform_1, window_bounds = array<i64: 1, 2, 128>}, {transform_indices = @transform_2, window_bounds = array<i64: 1, 8, 128>}]} {
    %c0 = arith.constant 0 : index
    %c0_0 = arith.constant 0 : index
    %c0_1 = arith.constant 0 : index
    %0 = vector.load %arg3[%c0, %c0_0, %c0_1] : memref<1x2x128xf32, #tpu.memory_space<vmem>>, vector<1x2x128xf32>
    %1 = vector.shape_cast %0 : vector<1x2x128xf32> to vector<2x128xf32>
    %2 = vector.extract_strided_slice %1 {offsets = [0, 0], sizes = [1, 128], strides = [1, 1]} : vector<2x128xf32> to vector<1x128xf32>
    %3 = vector.extract_strided_slice %1 {offsets = [1, 0], sizes = [1, 128], strides = [1, 1]} : vector<2x128xf32> to vector<1x128xf32>
    %cst = arith.constant 1.000000e+00 : f32
    %4 = vector.broadcast %cst : f32 to vector<1x128xf32>
    %5 = arith.addf %2, %4 : vector<1x128xf32>
    %cst_2 = arith.constant 1.600000e+01 : f32
    %6 = vector.broadcast %cst_2 : f32 to vector<1x128xf32>
    %7 = arith.mulf %5, %6 : vector<1x128xf32>
    %cst_3 = arith.constant 1.000000e+00 : f32
    %8 = vector.broadcast %cst_3 : f32 to vector<1x128xf32>
    %9 = arith.subf %7, %8 : vector<1x128xf32>
    %cst_4 = arith.constant 5.000000e-01 : f32
    %10 = vector.broadcast %cst_4 : f32 to vector<1x128xf32>
    %11 = arith.mulf %9, %10 : vector<1x128xf32>
    %cst_5 = arith.constant 1.000000e+00 : f32
    %12 = vector.broadcast %cst_5 : f32 to vector<1x128xf32>
    %13 = arith.addf %3, %12 : vector<1x128xf32>
    %cst_6 = arith.constant 1.600000e+01 : f32
    %14 = vector.broadcast %cst_6 : f32 to vector<1x128xf32>
    %15 = arith.mulf %13, %14 : vector<1x128xf32>
    %cst_7 = arith.constant 1.000000e+00 : f32
    %16 = vector.broadcast %cst_7 : f32 to vector<1x128xf32>
    %17 = arith.subf %15, %16 : vector<1x128xf32>
    %cst_8 = arith.constant 5.000000e-01 : f32
    %18 = vector.broadcast %cst_8 : f32 to vector<1x128xf32>
    %19 = arith.mulf %17, %18 : vector<1x128xf32>
    %20 = math.floor %11 : vector<1x128xf32>
    %21 = math.floor %19 : vector<1x128xf32>
    %22 = arith.subf %11, %20 : vector<1x128xf32>
    %23 = arith.subf %19, %21 : vector<1x128xf32>
    %24 = arith.fptosi %20 : vector<1x128xf32> to vector<1x128xi32>
    %25 = arith.fptosi %21 : vector<1x128xf32> to vector<1x128xi32>
    %c1_i32 = arith.constant 1 : i32
    %26 = vector.broadcast %c1_i32 : i32 to vector<1x128xi32>
    %27 = arith.addi %24, %26 : vector<1x128xi32>
    %c1_i32_9 = arith.constant 1 : i32
    %28 = vector.broadcast %c1_i32_9 : i32 to vector<1x128xi32>
    %29 = arith.addi %25, %28 : vector<1x128xi32>
    %c0_i32 = arith.constant 0 : i32
    %30 = vector.broadcast %c0_i32 : i32 to vector<1x128xi32>
    %31 = arith.cmpi sge, %24, %30 : vector<1x128xi32>
    %c16_i32 = arith.constant 16 : i32
    %32 = vector.broadcast %c16_i32 : i32 to vector<1x128xi32>
    %33 = arith.cmpi slt, %24, %32 : vector<1x128xi32>
    %34 = arith.andi %31, %33 : vector<1x128xi1>
    %c0_i32_10 = arith.constant 0 : i32
    %35 = vector.broadcast %c0_i32_10 : i32 to vector<1x128xi32>
    %36 = arith.cmpi sge, %27, %35 : vector<1x128xi32>
    %c16_i32_11 = arith.constant 16 : i32
    %37 = vector.broadcast %c16_i32_11 : i32 to vector<1x128xi32>
    %38 = arith.cmpi slt, %27, %37 : vector<1x128xi32>
    %39 = arith.andi %36, %38 : vector<1x128xi1>
    %c0_i32_12 = arith.constant 0 : i32
    %40 = vector.broadcast %c0_i32_12 : i32 to vector<1x128xi32>
    %41 = arith.cmpi sge, %25, %40 : vector<1x128xi32>
    %c16_i32_13 = arith.constant 16 : i32
    %42 = vector.broadcast %c16_i32_13 : i32 to vector<1x128xi32>
    %43 = arith.cmpi slt, %25, %42 : vector<1x128xi32>
    %44 = arith.andi %41, %43 : vector<1x128xi1>
    %c0_i32_14 = arith.constant 0 : i32
    %45 = vector.broadcast %c0_i32_14 : i32 to vector<1x128xi32>
    %46 = arith.cmpi sge, %29, %45 : vector<1x128xi32>
    %c16_i32_15 = arith.constant 16 : i32
    %47 = vector.broadcast %c16_i32_15 : i32 to vector<1x128xi32>
    %48 = arith.cmpi slt, %29, %47 : vector<1x128xi32>
    %49 = arith.andi %46, %48 : vector<1x128xi1>
    %cst_16 = arith.constant 0.000000e+00 : f32
    %50 = vector.broadcast %cst_16 : f32 to vector<1x128xf32>
    %51 = arith.andi %34, %44 : vector<1x128xi1>
    %cst_17 = arith.constant 1.000000e+00 : f32
    %52 = vector.broadcast %cst_17 : f32 to vector<1x128xf32>
    %53 = arith.subf %52, %22 : vector<1x128xf32>
    %cst_18 = arith.constant 1.000000e+00 : f32
    %54 = vector.broadcast %cst_18 : f32 to vector<1x128xf32>
    %55 = arith.subf %54, %23 : vector<1x128xf32>
    %56 = arith.mulf %53, %55 : vector<1x128xf32>
    %57 = arith.select %51, %56, %50 : vector<1x128xi1>, vector<1x128xf32>
    %58 = arith.andi %39, %44 : vector<1x128xi1>
    %cst_19 = arith.constant 1.000000e+00 : f32
    %59 = vector.broadcast %cst_19 : f32 to vector<1x128xf32>
    %60 = arith.subf %59, %23 : vector<1x128xf32>
    %61 = arith.mulf %22, %60 : vector<1x128xf32>
    %62 = arith.select %58, %61, %50 : vector<1x128xi1>, vector<1x128xf32>
    %63 = arith.andi %34, %49 : vector<1x128xi1>
    %cst_20 = arith.constant 1.000000e+00 : f32
    %64 = vector.broadcast %cst_20 : f32 to vector<1x128xf32>
    %65 = arith.subf %64, %22 : vector<1x128xf32>
    %66 = arith.mulf %65, %23 : vector<1x128xf32>
    %67 = arith.select %63, %66, %50 : vector<1x128xi1>, vector<1x128xf32>
    %68 = arith.andi %39, %49 : vector<1x128xi1>
    %69 = arith.mulf %22, %23 : vector<1x128xf32>
    %70 = arith.select %68, %69, %50 : vector<1x128xi1>, vector<1x128xf32>
    %c16_i32_21 = arith.constant 16 : i32
    %71 = vector.broadcast %c16_i32_21 : i32 to vector<1x128xi32>
    %72 = arith.muli %25, %71 : vector<1x128xi32>
    %73 = arith.addi %72, %24 : vector<1x128xi32>
    %c1_i32_22 = arith.constant 1 : i32
    %74 = vector.broadcast %c1_i32_22 : i32 to vector<1x128xi32>
    %75 = arith.addi %73, %74 : vector<1x128xi32>
    %c16_i32_23 = arith.constant 16 : i32
    %76 = vector.broadcast %c16_i32_23 : i32 to vector<1x128xi32>
    %77 = arith.addi %73, %76 : vector<1x128xi32>
    %c16_i32_24 = arith.constant 16 : i32
    %78 = vector.broadcast %c16_i32_24 : i32 to vector<1x128xi32>
    %79 = arith.addi %73, %78 : vector<1x128xi32>
    %c1_i32_25 = arith.constant 1 : i32
    %80 = vector.broadcast %c1_i32_25 : i32 to vector<1x128xi32>
    %81 = arith.addi %79, %80 : vector<1x128xi32>
    %cst_26 = arith.constant 0.000000e+00 : f32
    %82 = vector.broadcast %cst_26 : f32 to vector<8x128xf32>
    %c0_27 = arith.constant 0 : index
    %c0_28 = arith.constant 0 : index
    %83 = vector.load %arg5[%c0_27, %c0_28] : memref<8x128xf32, #tpu.memory_space<vmem>>, vector<8x128xf32>
    tpu.vector_store %arg5[%c0_27, %c0_28], %82 {strides = array<i32>} : memref<8x128xf32, #tpu.memory_space<vmem>>, vector<8x128xf32>,
    %c0_i32_29 = arith.constant 0 : i32
    %c256_i32 = arith.constant 256 : i32
    %84 = arith.muli %c0_i32_29, %c256_i32 : i32
    %85 = tpu.assume_multiple %84, 128 : i32
    %86 = tpu.iota {dimensions = array<i32: 0>} : vector<256x1xi32>
    %87 = vector.broadcast %85 : i32 to vector<256x1xi32>
    %88 = arith.addi %87, %86 : vector<256x1xi32>
    %89 = vector.broadcast %73 : vector<1x128xi32> to vector<256x128xi32>
    %90 = vector.broadcast %88 : vector<256x1xi32> to vector<256x128xi32>
    %91 = arith.cmpi eq, %89, %90 : vector<256x128xi32>
    %cst_30 = arith.constant 0.000000e+00 : f32
    %92 = vector.shape_cast %57 : vector<1x128xf32> to vector<1x128xf32>
    %93 = vector.broadcast %92 : vector<1x128xf32> to vector<256x128xf32>
    %94 = vector.broadcast %cst_30 : f32 to vector<256x128xf32>
    %95 = arith.select %91, %93, %94 : vector<256x128xi1>, vector<256x128xf32>
    %96 = vector.broadcast %75 : vector<1x128xi32> to vector<256x128xi32>
    %97 = vector.broadcast %88 : vector<256x1xi32> to vector<256x128xi32>
    %98 = arith.cmpi eq, %96, %97 : vector<256x128xi32>
    %cst_31 = arith.constant 0.000000e+00 : f32
    %99 = vector.shape_cast %62 : vector<1x128xf32> to vector<1x128xf32>
    %100 = vector.broadcast %99 : vector<1x128xf32> to vector<256x128xf32>
    %101 = vector.broadcast %cst_31 : f32 to vector<256x128xf32>
    %102 = arith.select %98, %100, %101 : vector<256x128xi1>, vector<256x128xf32>
    %103 = arith.addf %95, %102 : vector<256x128xf32>
    %104 = vector.broadcast %77 : vector<1x128xi32> to vector<256x128xi32>
    %105 = vector.broadcast %88 : vector<256x1xi32> to vector<256x128xi32>
    %106 = arith.cmpi eq, %104, %105 : vector<256x128xi32>
    %cst_32 = arith.constant 0.000000e+00 : f32
    %107 = vector.shape_cast %67 : vector<1x128xf32> to vector<1x128xf32>
    %108 = vector.broadcast %107 : vector<1x128xf32> to vector<256x128xf32>
    %109 = vector.broadcast %cst_32 : f32 to vector<256x128xf32>
    %110 = arith.select %106, %108, %109 : vector<256x128xi1>, vector<256x128xf32>
    %111 = arith.addf %103, %110 : vector<256x128xf32>
    %112 = vector.broadcast %81 : vector<1x128xi32> to vector<256x128xi32>
    %113 = vector.broadcast %88 : vector<256x1xi32> to vector<256x128xi32>
    %114 = arith.cmpi eq, %112, %113 : vector<256x128xi32>
    %cst_33 = arith.constant 0.000000e+00 : f32
    %115 = vector.shape_cast %70 : vector<1x128xf32> to vector<1x128xf32>
    %116 = vector.broadcast %115 : vector<1x128xf32> to vector<256x128xf32>
    %117 = vector.broadcast %cst_33 : f32 to vector<256x128xf32>
    %118 = arith.select %114, %116, %117 : vector<256x128xi1>, vector<256x128xf32>
    %119 = arith.addf %111, %118 : vector<256x128xf32>
    %c0_34 = arith.constant 0 : index
    %c0_35 = arith.constant 0 : index
    %120 = arith.index_cast %85 : i32 to index
    %121 = vector.load %arg2[%c0_34, %c0_35, %120] : memref<1x8x256xf32, #tpu.memory_space<vmem>>, vector<1x8x256xf32>
    %122 = vector.shape_cast %121 : vector<1x8x256xf32> to vector<8x256xf32>
    %c0_36 = arith.constant 0 : index
    %c0_37 = arith.constant 0 : index
    %123 = vector.load %arg5[%c0_36, %c0_37] : memref<8x128xf32, #tpu.memory_space<vmem>>, vector<8x128xf32>
    %cst_38 = arith.constant dense<0.000000e+00> : vector<8x128xf32>
    %124 = tpu.matmul %122, %119, %cst_38 {dimension_numbers = #tpu.dot_dimension_numbers<[1], [0], [0], [1], [0, 0, 1, 1], [], []>} : vector<8x256xf32>, vector<256x128xf32>, vector<8x128xf32> -> vector<8x128xf32>
    %125 = arith.addf %123, %124 : vector<8x128xf32>
    %c0_39 = arith.constant 0 : index
    %c0_40 = arith.constant 0 : index
    %126 = vector.load %arg5[%c0_39, %c0_40] : memref<8x128xf32, #tpu.memory_space<vmem>>, vector<8x128xf32>
    tpu.vector_store %arg5[%c0_39, %c0_40], %125 {strides = array<i32>} : memref<8x128xf32, #tpu.memory_space<vmem>>, vector<8x128xf32>,
    %c1_i32_41 = arith.constant 1 : i32
    %c0_42 = arith.constant 0 : index
    %c0_43 = arith.constant 0 : index
    %127 = vector.load %arg5[%c0_42, %c0_43] : memref<8x128xf32, #tpu.memory_space<vmem>>, vector<8x128xf32>
    %c0_44 = arith.constant 0 : index
    %c0_45 = arith.constant 0 : index
    %c0_46 = arith.constant 0 : index
    %128 = vector.load %arg4[%c0_44, %c0_45, %c0_46] : memref<1x8x128xf32, #tpu.memory_space<vmem>>, vector<1x8x128xf32>
    %129 = vector.shape_cast %128 : vector<1x8x128xf32> to vector<8x128xf32>
    %130 = vector.shape_cast %127 : vector<8x128xf32> to vector<1x8x128xf32>
    tpu.vector_store %arg4[%c0_44, %c0_45, %c0_46], %130 {strides = array<i32>} : memref<1x8x128xf32, #tpu.memory_space<vmem>>, vector<1x8x128xf32>,
    return
  }
  func.func @transform_0(%arg0: i32, %arg1: i32) -> (i32, i32, i32) {
    %c0_i32 = arith.constant 0 : i32
    %c0_i32_0 = arith.constant 0 : i32
    %c0_i32_1 = arith.constant 0 : i32
    return %arg0, %c0_i32, %c0_i32_0 : i32, i32, i32
  }
  func.func @transform_1(%arg0: i32, %arg1: i32) -> (i32, i32, i32) {
    %c0_i32 = arith.constant 0 : i32
    %c0_i32_0 = arith.constant 0 : i32
    return %arg0, %c0_i32, %arg1 : i32, i32, i32
  }
  func.func @transform_2(%arg0: i32, %arg1: i32) -> (i32, i32, i32) {
    %c0_i32 = arith.constant 0 : i32
    %c0_i32_0 = arith.constant 0 : i32
    return %arg0, %c0_i32, %arg1 : i32, i32, i32
  }
}

</mosaic_0001>

<bundles_post_ra>
// kernel: tpu_custom_call.1
= control target key start
LH: loop header
LB: loop body
LE: loop exit
PB: predicated region body
PF: predicated region fallthrough
CT: control target
= control target key end

     0   :  { %7 = vsyncpa [#allocation4], 0  ;;  %s1655_s0 = inlined_call_operand.hbm [shape: f32[2,8,256], index: 0, kind: input, shape index: {}]   ;;  %s1656_s1 = inlined_call_operand.hbm [shape: f32[2,2,128], index: 1, kind: input, shape index: {}]   ;;  %s1657_s2 = inlined_call_operand.hbm [shape: f32[2,8,128], index: 2, kind: output, shape index: {}]  }
   0x1   :  { %9 = vsyncpa [#allocation4 + $0x1], 0 }
   0x2   :  { %10 = vsyncpa [#allocation7], 0 }
   0x3   :  { %12 = vsyncpa [#allocation7 + $0x1], 0 }
   0x4   :  { %13 = vsyncpa [#allocation5], 0 }
   0x5   :  { %15 = vsyncpa [#allocation5 + $0x1], 0  ;;  %s1111_s9 = smov 0   ;;  %s1113_s10 = smov 0  }
   0x6   :  { %s1115_s11 = smov 0   ;;  %s1117_s12 = smov 0  }
   0x7   :  { %s1119_s13 = smov 0   ;;  %s1121_s14 = smov 0  }
   0x8 LB: > { %s858_s15 = sadd.s32 4294967295, %s1093_s14   ;;  %s859_s16 = sadd.s32 4294967294, %s1093_s14   ;;  %s1093_s14 = sphi %s1121_s14, %s21_s14   ;;  %s1089_s13 = sphi %s1119_s13, %s1671_s13   ;;  %s1085_s12 = sphi %s1117_s12, %s1670_s12   ;;  %s1081_s11 = sphi %s1115_s11, %s1669_s11   ;;  %s1077_s10 = sphi %s1113_s10, %s1668_s10   ;;  %s1073_s9 = sphi %s1111_s9, %s1667_s9  }
   0x9   : > { %s33_s17 = sadd.s32 1, %s1089_s13  ;;  %s40_s18 = sadd.s32 1, %s1081_s11 }
   0xa   : > { %p35_p0 = scmp.ge.s32.totalorder %s33_s17, 2  ;;  %p47_p1 = scmp.ne.s32.totalorder %s1081_s11, %s1077_s10 }
   0xb   : > { %p48_p2 = scmp.eq.s32.totalorder %s1093_s14, 0  ;;  %p53_p3 = scmp.ne.s32.totalorder %s1077_s10, %s1073_s9 }
   0xc   : > { %s1673_s17 = smov (%p35_p0, %s33_s17), 0  ;;  %p54_p5 = scmp.eq.s32.totalorder %s858_s15, 0 }
   0xd   : > { %p1152_p4 = por %p48_p2, %p47_p1  ;;  %s37_s20 = ssub.s32 %s1089_s13, %s1673_s17 }
   0xe   : > { %p107_p6 = scmp.eq.s32.totalorder %s858_s15, 1  ;;  %p38_p7 = scmp.eq.s32.totalorder %s37_s20, 0 }
   0xf   : > { %p1158_p8 = por %p54_p5, %p53_p3  ;;  %p113_p10 = scmp.eq.s32.totalorder %s859_s16, 1 }
  0x10   : > { %p1162_p9 = por %p107_p6, %p47_p1  ;;  %p861_p12 = scmp.ge.s32.totalorder %s1093_s14, 2 }
  0x11   : > { %s1167_s23 = scalar_select %p38_p7, %s1081_s11, %s40_s18  }
  0x12   : > { %p1169_p11 = por %p113_p10, %p53_p3  ;;  %p896_p13 = scmp.lt.s32.totalorder %s1093_s14, 2 }
  0x13   : > { %s133_s25 = sand.u32 1, %s1081_s11   ;;  %s876_s27 = sshll.u32 %s1089_s13, 4 }
  0x14   : > { %s862_s26 = sshll.u32 %s133_s25, 4  ;;  %s142_s30 = scalar_lea.hbm %s1655_s0, %s876_s27 }
  0x15   : > { %s137_s3 = scalar_lea.vmem [#allocation3], %s862_s26  ;;  %s144_s5 = sshll.u32 %s142_s30, 4  ;;  %s145_s5 = int_to_ptr.hbm [resolvable:$true] %s144_s5 }
  0x16   : > { %s146_s4 = sshll.u32 %s137_s3, 4  ;;  %p1182_p0 = pnand %p896_p13, %p1152_p4  ;;  %s147_s4 = int_to_ptr.vmem [resolvable:$true] %s146_s4 }
  0x17   : > { %p867_p1 = scmp.ge.s32.totalorder %s1093_s14, 1  ;;  %p171_p2 = scmp.lt.s32.totalorder %s1093_s14, 3 }
  0x18   : > { %s134_s7 = scalar_lea.sflag [#allocation4], %s133_s25  ;;  %s865_s8 = sshll.u32 %s133_s25, 1 }
  0x19   : > { %888 = dma.hbm_to_vmem [thread:$0]  (!%p1182_p0), %s145_s5, 256, %s147_s4, %s134_s7  }
  0x1a   : > { %p172_p3 = pnand %p867_p1, %p171_p2  ;;  %s866_s15 = sshll.u32 %s1089_s13, 1 }
  0x1b   : > { %s162_s20 = scalar_lea.hbm %s1656_s1, %s866_s15  ;;  %s157_s26 = scalar_lea.vmem [#allocation6], %s865_s8 }
  0x1c   : > { %s166_s19 = sshll.u32 %s157_s26, 4  ;;  %s164_s27 = sshll.u32 %s162_s20, 4  ;;  %s167_s19 = int_to_ptr.vmem [resolvable:$true] %s166_s19  ;;  %s165_s27 = int_to_ptr.hbm [resolvable:$true] %s164_s27 }
  0x1d   : > { %s154_s28 = scalar_lea.sflag [#allocation7], %s133_s25  ;;  %175 = sbr.rel (%p172_p3) target bundleno = 292 (0x124), region = 28 }
  0x1e   : > { %891 = dma.hbm_to_vmem [thread:$0]  (!%p1182_p0), %s165_s27, 32, %s167_s19, %s154_s28  }
  0x1f   : > { %s1197_s29 = sand.u32 (!%p172_p3), 1, %s1077_s10  }
  0x20   : > { %s868_s30 = sshll.u32 (!%p172_p3), %s1197_s29, 4  ;;  %s178_s3 = scalar_lea.sflag (!%p172_p3), [#allocation4], %s1197_s29 }
  0x21   : > { %s1201_s4 = scalar_lea.vmem (!%p172_p3), [#allocation3], %s868_s30 }
  0x22   : > { %1060 = dma.done.wait (%p1158_p8), %s178_s3, 256  }
  0x23   : > { %1062 = vsyncadd (%p1158_p8), %s178_s3, 4294967040  ;;  %s869_s25 = sshll.u32 %s1197_s29, 1  ;;  %s188_s5 = scalar_lea.sflag [#allocation7], %s1197_s29 }
  0x24   : > { %s191_s6 = scalar_lea.vmem [#allocation6], %s869_s25 }
  0x25   : > { %1064 = dma.done.wait (%p1158_p8), %s188_s5, 32  }
  0x26   : > { %1066 = vsyncadd (%p1158_p8), %s188_s5, 4294967264  ;;  %v218_v0 = vld [vmem:[%s191_s6] sm:$0x3]  ;;  %v265_v2 = vlaneseq  ;;  %v1095_v24 = vmov 0   ;;  %s870_s21 = sshll.u32 %s1197_s29, 3  ;;  %s873_s7 = sshll.u32 %s1085_s12, 3 }
  0x27   : > { %v219_v1 = vadd.f32 1.0, %v218_v0  ;;  %s750_s16 = scalar_lea.hbm %s1657_s2, %s873_s7  ;;  %s217_s18 = scalar_lea.vmem [#allocation8], %s870_s21 }
  0x28   : > { %v1213_v5 = vshrl.u32 %v265_v2, 7  ;;  %s752_s20 = sshll.u32 %s217_s18, 4  ;;  %s754_s26 = sshll.u32 %s750_s16, 4  ;;  %s753_s20 = int_to_ptr.vmem [resolvable:$true] %s752_s20  ;;  %s755_s26 = int_to_ptr.hbm [resolvable:$true] %s754_s26 }
  0x29   : > { %v220_v3 = vmul.f32 16.0, %v219_v1  ;;  %s739_s19 = scalar_lea.sflag [#allocation5], %s1197_s29  ;;  %s1021_s27 = sshra.s32 %s755_s26, 4  ;;  %s1022_s27 = int_to_ptr.hbm [resolvable:$true] %s1021_s27 }
  0x2a   : > { %v1216_v8 = vadd.s32 120, %v1213_v5  ;;  %v1219_v11 = vadd.s32 248, %v1213_v5  ;;  %v1222_v12 = vadd.s32 112, %v1213_v5  ;;  %v1225_v13 = vadd.s32 240, %v1213_v5  ;;  %s1023_s28 = scalar_lea.hbm %s1022_s27, 8  ;;  %s1027_s3 = scalar_lea.hbm %s1657_s2, 16 }
  0x2b   : > { %v871_v4 = vadd.f32 -1.0, %v220_v3  ;;  %v1228_v14 = vadd.s32 104, %v1213_v5  ;;  %v1231_v15 = vadd.s32 232, %v1213_v5  ;;  %v1234_v16 = vadd.s32 96, %v1213_v5  ;;  %p1024_p4 = scmp.ne.s32.totalorder %s1022_s27, %s1023_s28  ;;  %p1028_p7 = scmp.lt.s32.totalorder %s1022_s27, %s1657_s2 }
  0x2c   : > { %v1241_v23 = vadd.s32 224, %v1213_v5  ;;  %v1250_v30 = vadd.s32 88, %v1213_v5  ;;  %v1253_v31 = vadd.s32 216, %v1213_v5  ;;  %v1262_v41 = vadd.s32 80, %v1213_v5  ;;  %p1029_p8 = scmp.lt.s32.totalorder %s1027_s3, %s1023_s28 }
  0x2d   : > { %v222_v6 = vmul.f32 0.5, %v871_v4  ;;  %v1265_v42 = vadd.s32 208, %v1213_v5  ;;  %p1025_p5 = pnand %p1024_p4, %p1162_p9 }
  0x2e   : > { %p1030_p10 = por %p1029_p8, %p1028_p7 }
  0x2f   : > { %v223_v7 = vfloor.f32 %v222_v6  ;;  %p1026_p6 = pneg %p1025_p5 }
  0x31   : > { %v224_v9 = vsub.f32 %v222_v6, %v223_v7  ;;  %v878_v10 = vcvt.f32.s32 %v223_v7  ;;  %p1031_p13 = pnand %p1030_p10, %p1026_p6 }
  0x33   : > { %v226_v17 = vadd.s32 1, %v878_v10  ;;  %vm227_vm0 = vcmp.ge.s32.totalorder %v878_v10, 0  ;;  %vm228_vm1 = vcmp.lt.s32.totalorder %v878_v10, 16  ;;  %v237_v18 = vsub.f32 1.0, %v224_v9 }
  0x34   : > { %vm1236_vm2 = vmand %vm227_vm0, %vm228_vm1  ;;  %v251_v20 = vrot.slane %v224_v9, 1  ;;  %v258_v21 = vmul.u32 16, %v878_v10  ;;  %v259_v22 = vrot.slane %v878_v10, 7 }
  0x35   : > { %vm230_vm3 = vcmp.ge.s32.totalorder %v226_v17, 0  ;;  %vm231_vm4 = vcmp.lt.s32.totalorder %v226_v17, 16  ;;  %v233_v25 = vsel %vm1236_vm2, 1, %v1095_v24  ;;  %v239_v26 = vrot.slane %v237_v18, 1 }
  0x36   : > { %vm1245_vm5 = vmand %vm230_vm3, %vm231_vm4  ;;  %v234_v28 = vrot.slane %v233_v25, 1  ;;  %v260_v29 = vadd.s32 %v259_v22, %v258_v21  ;;  %v253_v35 = vmul.f32 %v251_v20, %v237_v18  ;;  %v256_v39 = vmul.f32 %v251_v20, %v224_v9 }
  0x37   : > { %v241_v32 = vmul.f32 %v239_v26, %v237_v18  ;;  %v244_v33 = vmul.f32 %v239_v26, %v224_v9  ;;  %v246_v34 = vsel %vm1245_vm5, 1, %v1095_v24 }
  0x38   : > { %vm235_vm6 = vcmp.ne.s32.totalorder %v234_v28, 0  ;;  %v247_v36 = vrot.slane %v246_v34, 1  ;;  %v261_v37 = vadd.s32 1, %v260_v29  ;;  %v262_v38 = vadd.s32 16, %v260_v29 }
  0x39   : > { %vm236_vm7 = vmand %vm1236_vm2, %vm235_vm6  ;;  %v1259_v40 = vperm.slane %v260_v29, 1 }
  0x3a   : > { %v242_v43 = vsel %vm236_vm7, %v241_v32, 0.0  ;;  %vm243_vm8 = vmand %vm1245_vm5, %vm235_vm6  ;;  %vm248_vm9 = vcmp.ne.s32.totalorder %v247_v36, 0  ;;  %v263_v44 = vadd.s32 1, %v262_v38  ;;  %v1269_v45 = vperm.slane %v261_v37, 1 }
  0x3b   : > { %v245_v46 = vsel %vm243_vm8, %v244_v33, 0.0  ;;  %vm249_vm10 = vmand %vm1236_vm2, %vm248_vm9  ;;  %v1273_v47 = vperm.slane %v242_v43, 0  ;;  %v1275_v48 = vperm.slane %v262_v38, 1  ;;  %vm347_vm11 = vcmp.eq.s32.totalorder %v1259_v40, %v1216_v8 }
  0x3c   : > { %v254_v49 = vsel %vm249_vm10, %v253_v35, 0.0  ;;  %vm255_vm12 = vmand %vm1245_vm5, %vm248_vm9  ;;  %v1281_v50 = vperm.slane %v245_v46, 0  ;;  %v1283_v51 = vperm.slane %v263_v44, 1  ;;  %vm413_vm13 = vcmp.eq.s32.totalorder %v1269_v45, %v1216_v8 }
  0x3d   : > { %v257_v52 = vsel %vm255_vm12, %v256_v39, 0.0  ;;  %v1287_v53 = vperm.slane %v254_v49, 0  ;;  %v380_v54 = vsel %vm347_vm11, %v1273_v47, 0.0  ;;  %vm511_vm14 = vcmp.eq.s32.totalorder %v1275_v48, %v1216_v8 }
  0x3e   : > { %v1292_v55 = vperm.slane %v257_v52, 0  ;;  %v446_v56 = vsel %vm413_vm13, %v1281_v50, 0.0  ;;  %vm609_vm15 = vcmp.eq.s32.totalorder %v1283_v51, %v1216_v8  ;;  %vm363_vm0 = vcmp.eq.s32.totalorder %v1259_v40, %v1219_v11 }
  0x3f   : > { %v478_v57 = vadd.f32 %v446_v56, %v380_v54  ;;  %v544_v58 = vsel %vm511_vm14, %v1287_v53, 0.0  ;;  %v396_v59 = vsel %vm363_vm0, %v1273_v47, 0.0  ;;  %vm429_vm1 = vcmp.eq.s32.totalorder %v1269_v45, %v1219_v11 }
  0x40   : > { %v642_v60 = vsel %vm609_vm15, %v1292_v55, 0.0  ;;  %v462_v61 = vsel %vm429_vm1, %v1281_v50, 0.0  ;;  %vm527_vm2 = vcmp.eq.s32.totalorder %v1275_v48, %v1219_v11  ;;  %vm625_vm3 = vcmp.eq.s32.totalorder %v1283_v51, %v1219_v11 }
  0x41   : > { %v576_v62 = vadd.f32 %v544_v58, %v478_v57  ;;  %v494_v63 = vadd.f32 %v462_v61, %v396_v59  ;;  %v560_v0 = vsel %vm527_vm2, %v1287_v53, 0.0  ;;  %v658_v1 = vsel %vm625_vm3, %v1292_v55, 0.0 }
  0x42   : > { %vm346_vm4 = vcmp.eq.s32.totalorder %v1259_v40, %v1222_v12  ;;  %vm412_vm5 = vcmp.eq.s32.totalorder %v1269_v45, %v1222_v12  ;;  %vm510_vm6 = vcmp.eq.s32.totalorder %v1275_v48, %v1222_v12  ;;  %vm608_vm7 = vcmp.eq.s32.totalorder %v1283_v51, %v1222_v12 }
  0x43   : > { %v674_v2 = vadd.f32 %v642_v60, %v576_v62  ;;  %v592_v3 = vadd.f32 %v560_v0, %v494_v63  ;;  %v379_v4 = vsel %vm346_vm4, %v1273_v47, 0.0  ;;  %v445_v6 = vsel %vm412_vm5, %v1281_v50, 0.0 }
  0x44   : > { %v477_v7 = vadd.f32 %v445_v6, %v379_v4  ;;  %v543_v8 = vsel %vm510_vm6, %v1287_v53, 0.0  ;;  %v641_v9 = vsel %vm608_vm7, %v1292_v55, 0.0  ;;  %vm362_vm8 = vcmp.eq.s32.totalorder %v1259_v40, %v1225_v13 }
  0x45   : > { %694 = vmatpush.msra.mxu0 %v674_v2  ;;  %v690_v10 = vadd.f32 %v658_v1, %v592_v3  ;;  %v395_v11 = vsel %vm362_vm8, %v1273_v47, 0.0  ;;  %vm428_vm9 = vcmp.eq.s32.totalorder %v1269_v45, %v1225_v13  ;;  %vm526_vm10 = vcmp.eq.s32.totalorder %v1275_v48, %v1225_v13 }
  0x46   : > { %v575_v12 = vadd.f32 %v543_v8, %v477_v7  ;;  %v461_v17 = vsel %vm428_vm9, %v1281_v50, 0.0  ;;  %v559_v18 = vsel %vm526_vm10, %v1287_v53, 0.0  ;;  %vm624_vm11 = vcmp.eq.s32.totalorder %v1283_v51, %v1225_v13 }
  0x47   : > { %714 = vmatpush.msra.mxu1 %v690_v10  ;;  %v493_v19 = vadd.f32 %v461_v17, %v395_v11  ;;  %v657_v20 = vsel %vm624_vm11, %v1292_v55, 0.0  ;;  %vm345_vm12 = vcmp.eq.s32.totalorder %v1259_v40, %v1228_v14  ;;  %vm411_vm13 = vcmp.eq.s32.totalorder %v1269_v45, %v1228_v14 }
  0x48   : > { %v673_v21 = vadd.f32 %v641_v9, %v575_v12  ;;  %v378_v22 = vsel %vm345_vm12, %v1273_v47, 0.0  ;;  %v444_v24 = vsel %vm411_vm13, %v1281_v50, 0.0  ;;  %vm509_vm14 = vcmp.eq.s32.totalorder %v1275_v48, %v1228_v14 }
  0x49   : > { %v591_v25 = vadd.f32 %v559_v18, %v493_v19  ;;  %v476_v13 = vadd.f32 %v444_v24, %v378_v22  ;;  %v542_v26 = vsel %vm509_vm14, %v1287_v53, 0.0  ;;  %vm607_vm15 = vcmp.eq.s32.totalorder %v1283_v51, %v1228_v14 }
  0x4a   : > { %695 = vmatpush.msra.mxu0 %v673_v21  ;;  %v640_v27 = vsel %vm607_vm15, %v1292_v55, 0.0  ;;  %vm361_vm0 = vcmp.eq.s32.totalorder %v1259_v40, %v1231_v15  ;;  %vm427_vm1 = vcmp.eq.s32.totalorder %v1269_v45, %v1231_v15  ;;  %vm525_vm2 = vcmp.eq.s32.totalorder %v1275_v48, %v1231_v15 }
  0x4b   : > { %v689_v28 = vadd.f32 %v657_v20, %v591_v25  ;;  %v574_v29 = vadd.f32 %v542_v26, %v476_v13  ;;  %v394_v32 = vsel %vm361_vm0, %v1273_v47, 0.0  ;;  %v460_v33 = vsel %vm427_vm1, %v1281_v50, 0.0 }
  0x4c   : > { %v492_v34 = vadd.f32 %v460_v33, %v394_v32  ;;  %v558_v14 = vsel %vm525_vm2, %v1287_v53, 0.0  ;;  %vm623_vm3 = vcmp.eq.s32.totalorder %v1283_v51, %v1231_v15  ;;  %vm344_vm4 = vcmp.eq.s32.totalorder %v1259_v40, %v1234_v16 }
  0x4d   : > { %715 = vmatpush.msra.mxu1 %v689_v28  ;;  %v672_v35 = vadd.f32 %v640_v27, %v574_v29  ;;  %v656_v36 = vsel %vm623_vm3, %v1292_v55, 0.0  ;;  %v377_v37 = vsel %vm344_vm4, %v1273_v47, 0.0  ;;  %vm410_vm5 = vcmp.eq.s32.totalorder %v1269_v45, %v1234_v16 }
  0x4e   : > { %v590_v38 = vadd.f32 %v558_v14, %v492_v34  ;;  %v443_v39 = vsel %vm410_vm5, %v1281_v50, 0.0  ;;  %vm508_vm6 = vcmp.eq.s32.totalorder %v1275_v48, %v1234_v16  ;;  %vm606_vm7 = vcmp.eq.s32.totalorder %v1283_v51, %v1234_v16 }
  0x4f   : > { %696 = vmatpush.msra.mxu0 %v672_v35  ;;  %v475_v15 = vadd.f32 %v443_v39, %v377_v37  ;;  %v541_v43 = vsel %vm508_vm6, %v1287_v53, 0.0  ;;  %v639_v44 = vsel %vm606_vm7, %v1292_v55, 0.0  ;;  %vm360_vm8 = vcmp.eq.s32.totalorder %v1259_v40, %v1241_v23 }
  0x50   : > { %v688_v46 = vadd.f32 %v656_v36, %v590_v38  ;;  %v393_v49 = vsel %vm360_vm8, %v1273_v47, 0.0  ;;  %vm426_vm9 = vcmp.eq.s32.totalorder %v1269_v45, %v1241_v23  ;;  %vm524_vm10 = vcmp.eq.s32.totalorder %v1275_v48, %v1241_v23 }
  0x51   : > { %v573_v52 = vadd.f32 %v541_v43, %v475_v15  ;;  %v459_v16 = vsel %vm426_vm9, %v1281_v50, 0.0  ;;  %v557_v54 = vsel %vm524_vm10, %v1287_v53, 0.0  ;;  %vm622_vm11 = vcmp.eq.s32.totalorder %v1283_v51, %v1241_v23 }
  0x52   : > { %716 = vmatpush.msra.mxu1 %v688_v46  ;;  %v491_v56 = vadd.f32 %v459_v16, %v393_v49  ;;  %v655_v57 = vsel %vm622_vm11, %v1292_v55, 0.0  ;;  %vm343_vm12 = vcmp.eq.s32.totalorder %v1259_v40, %v1250_v30  ;;  %vm409_vm13 = vcmp.eq.s32.totalorder %v1269_v45, %v1250_v30 }
  0x53   : > { %v671_v58 = vadd.f32 %v639_v44, %v573_v52  ;;  %v376_v59 = vsel %vm343_vm12, %v1273_v47, 0.0  ;;  %v442_v60 = vsel %vm409_vm13, %v1281_v50, 0.0  ;;  %vm507_vm14 = vcmp.eq.s32.totalorder %v1275_v48, %v1250_v30 }
  0x54   : > { %v589_v61 = vadd.f32 %v557_v54, %v491_v56  ;;  %v474_v23 = vadd.f32 %v442_v60, %v376_v59  ;;  %v540_v62 = vsel %vm507_vm14, %v1287_v53, 0.0  ;;  %vm605_vm15 = vcmp.eq.s32.totalorder %v1283_v51, %v1250_v30 }
  0x55   : > { %697 = vmatpush.msra.mxu0 %v671_v58  ;;  %v638_v63 = vsel %vm605_vm15, %v1292_v55, 0.0  ;;  %vm359_vm0 = vcmp.eq.s32.totalorder %v1259_v40, %v1253_v31  ;;  %vm425_vm1 = vcmp.eq.s32.totalorder %v1269_v45, %v1253_v31  ;;  %vm523_vm2 = vcmp.eq.s32.totalorder %v1275_v48, %v1253_v31 }
  0x56   : > { %v687_v0 = vadd.f32 %v655_v57, %v589_v61  ;;  %v572_v1 = vadd.f32 %v540_v62, %v474_v23  ;;  %v392_v2 = vsel %vm359_vm0, %v1273_v47, 0.0  ;;  %v458_v3 = vsel %vm425_vm1, %v1281_v50, 0.0 }
  0x57   : > { %v490_v4 = vadd.f32 %v458_v3, %v392_v2  ;;  %v556_v30 = vsel %vm523_vm2, %v1287_v53, 0.0  ;;  %vm621_vm3 = vcmp.eq.s32.totalorder %v1283_v51, %v1253_v31  ;;  %vm342_vm4 = vcmp.eq.s32.totalorder %v1259_v40, %v1262_v41 }
  0x58   : > { %717 = vmatpush.msra.mxu1 %v687_v0  ;;  %v670_v6 = vadd.f32 %v638_v63, %v572_v1  ;;  %v654_v7 = vsel %vm621_vm3, %v1292_v55, 0.0  ;;  %v375_v8 = vsel %vm342_vm4, %v1273_v47, 0.0  ;;  %vm408_vm5 = vcmp.eq.s32.totalorder %v1269_v45, %v1262_v41 }
  0x59   : > { %v588_v9 = vadd.f32 %v556_v30, %v490_v4  ;;  %v441_v10 = vsel %vm408_vm5, %v1281_v50, 0.0  ;;  %vm506_vm6 = vcmp.eq.s32.totalorder %v1275_v48, %v1262_v41  ;;  %vm604_vm7 = vcmp.eq.s32.totalorder %v1283_v51, %v1262_v41 }
  0x5a   : > { %698 = vmatpush.msra.mxu0 %v670_v6  ;;  %v473_v31 = vadd.f32 %v441_v10, %v375_v8  ;;  %v539_v11 = vsel %vm506_vm6, %v1287_v53, 0.0  ;;  %v637_v12 = vsel %vm604_vm7, %v1292_v55, 0.0  ;;  %vm358_vm8 = vcmp.eq.s32.totalorder %v1259_v40, %v1265_v42 }
  0x5b   : > { %v686_v17 = vadd.f32 %v654_v7, %v588_v9  ;;  %v391_v18 = vsel %vm358_vm8, %v1273_v47, 0.0  ;;  %vm424_vm9 = vcmp.eq.s32.totalorder %v1269_v45, %v1265_v42  ;;  %vm522_vm10 = vcmp.eq.s32.totalorder %v1275_v48, %v1265_v42 }
  0x5c   : > { %v571_v19 = vadd.f32 %v539_v11, %v473_v31  ;;  %v457_v41 = vsel %vm424_vm9, %v1281_v50, 0.0  ;;  %v555_v20 = vsel %vm522_vm10, %v1287_v53, 0.0  ;;  %vm620_vm11 = vcmp.eq.s32.totalorder %v1283_v51, %v1265_v42 }
  0x5d   : > { %718 = vmatpush.msra.mxu1 %v686_v17  ;;  %v489_v21 = vadd.f32 %v457_v41, %v391_v18  ;;  %v653_v22 = vsel %vm620_vm11, %v1292_v55, 0.0  ;;  %v275_v24 = vadd.s32 72, %v1213_v5  ;;  %v291_v25 = vadd.s32 200, %v1213_v5 }
  0x5e   : > { %v669_v13 = vadd.f32 %v637_v12, %v571_v19  ;;  %v274_v26 = vadd.s32 64, %v1213_v5  ;;  %v290_v27 = vadd.s32 192, %v1213_v5  ;;  %v273_v28 = vadd.s32 56, %v1213_v5 }
  0x5f   : > { %v587_v29 = vadd.f32 %v555_v20, %v489_v21  ;;  %vm341_vm12 = vcmp.eq.s32.totalorder %v1259_v40, %v275_v24  ;;  %vm407_vm13 = vcmp.eq.s32.totalorder %v1269_v45, %v275_v24  ;;  %vm505_vm14 = vcmp.eq.s32.totalorder %v1275_v48, %v275_v24 }
  0x60   : > { %699 = vmatpush.msra.mxu0 %v669_v13  ;;  %v374_v42 = vsel %vm341_vm12, %v1273_v47, 0.0  ;;  %v440_v32 = vsel %vm407_vm13, %v1281_v50, 0.0  ;;  %v538_v33 = vsel %vm505_vm14, %v1287_v53, 0.0  ;;  %vm603_vm15 = vcmp.eq.s32.totalorder %v1283_v51, %v275_v24 }
  0x61   : > { %v685_v34 = vadd.f32 %v653_v22, %v587_v29  ;;  %v472_v14 = vadd.f32 %v440_v32, %v374_v42  ;;  %v636_v35 = vsel %vm603_vm15, %v1292_v55, 0.0  ;;  %vm357_vm0 = vcmp.eq.s32.totalorder %v1259_v40, %v291_v25 }
  0x62   : > { %v390_v36 = vsel %vm357_vm0, %v1273_v47, 0.0  ;;  %vm423_vm1 = vcmp.eq.s32.totalorder %v1269_v45, %v291_v25  ;;  %vm521_vm2 = vcmp.eq.s32.totalorder %v1275_v48, %v291_v25  ;;  %vm619_vm3 = vcmp.eq.s32.totalorder %v1283_v51, %v291_v25 }
  0x63   : > { %719 = vmatpush.msra.mxu1 %v685_v34  ;;  %v570_v37 = vadd.f32 %v538_v33, %v472_v14  ;;  %v456_v38 = vsel %vm423_vm1, %v1281_v50, 0.0  ;;  %v554_v39 = vsel %vm521_vm2, %v1287_v53, 0.0  ;;  %v652_v15 = vsel %vm619_vm3, %v1292_v55, 0.0 }
  0x64   : > { %v488_v43 = vadd.f32 %v456_v38, %v390_v36  ;;  %vm340_vm4 = vcmp.eq.s32.totalorder %v1259_v40, %v274_v26  ;;  %vm406_vm5 = vcmp.eq.s32.totalorder %v1269_v45, %v274_v26  ;;  %vm504_vm6 = vcmp.eq.s32.totalorder %v1275_v48, %v274_v26 }
  0x65   : > { %v668_v44 = vadd.f32 %v636_v35, %v570_v37  ;;  %v373_v46 = vsel %vm340_vm4, %v1273_v47, 0.0  ;;  %v439_v49 = vsel %vm406_vm5, %v1281_v50, 0.0  ;;  %v537_v52 = vsel %vm504_vm6, %v1287_v53, 0.0 }
  0x66   : > { %v586_v16 = vadd.f32 %v554_v39, %v488_v43  ;;  %v471_v54 = vadd.f32 %v439_v49, %v373_v46  ;;  %vm602_vm7 = vcmp.eq.s32.totalorder %v1283_v51, %v274_v26  ;;  %vm356_vm8 = vcmp.eq.s32.totalorder %v1259_v40, %v290_v27 }
  0x67   : > { %700 = vmatpush.msra.mxu0 %v668_v44  ;;  %v635_v56 = vsel %vm602_vm7, %v1292_v55, 0.0  ;;  %v389_v57 = vsel %vm356_vm8, %v1273_v47, 0.0  ;;  %vm422_vm9 = vcmp.eq.s32.totalorder %v1269_v45, %v290_v27  ;;  %vm520_vm10 = vcmp.eq.s32.totalorder %v1275_v48, %v290_v27 }
  0x68   : > { %v684_v58 = vadd.f32 %v652_v15, %v586_v16  ;;  %v569_v59 = vadd.f32 %v537_v52, %v471_v54  ;;  %v455_v60 = vsel %vm422_vm9, %v1281_v50, 0.0  ;;  %v553_v61 = vsel %vm520_vm10, %v1287_v53, 0.0 }
  0x69   : > { %v487_v23 = vadd.f32 %v455_v60, %v389_v57  ;;  %vm618_vm11 = vcmp.eq.s32.totalorder %v1283_v51, %v290_v27  ;;  %vm339_vm12 = vcmp.eq.s32.totalorder %v1259_v40, %v273_v28  ;;  %vm405_vm13 = vcmp.eq.s32.totalorder %v1269_v45, %v273_v28 }
  0x6a   : > { %720 = vmatpush.msra.mxu1 %v684_v58  ;;  %v667_v62 = vadd.f32 %v635_v56, %v569_v59  ;;  %v651_v63 = vsel %vm618_vm11, %v1292_v55, 0.0  ;;  %v372_v0 = vsel %vm339_vm12, %v1273_v47, 0.0  ;;  %v438_v1 = vsel %vm405_vm13, %v1281_v50, 0.0 }
  0x6b   : > { %v585_v2 = vadd.f32 %v553_v61, %v487_v23  ;;  %v470_v3 = vadd.f32 %v438_v1, %v372_v0  ;;  %vm503_vm14 = vcmp.eq.s32.totalorder %v1275_v48, %v273_v28  ;;  %vm601_vm15 = vcmp.eq.s32.totalorder %v1283_v51, %v273_v28 }
  0x6c   : > { %701 = vmatpush.msra.mxu0 %v667_v62  ;;  %v536_v4 = vsel %vm503_vm14, %v1287_v53, 0.0  ;;  %v634_v30 = vsel %vm601_vm15, %v1292_v55, 0.0  ;;  %v289_v6 = vadd.s32 184, %v1213_v5  ;;  %v272_v7 = vadd.s32 48, %v1213_v5 }
  0x6d   : > { %v683_v8 = vadd.f32 %v651_v63, %v585_v2  ;;  %v568_v9 = vadd.f32 %v536_v4, %v470_v3  ;;  %v288_v10 = vadd.s32 176, %v1213_v5  ;;  %v271_v31 = vadd.s32 40, %v1213_v5 }
  0x6e   : > { %vm355_vm0 = vcmp.eq.s32.totalorder %v1259_v40, %v289_v6  ;;  %vm421_vm1 = vcmp.eq.s32.totalorder %v1269_v45, %v289_v6  ;;  %vm519_vm2 = vcmp.eq.s32.totalorder %v1275_v48, %v289_v6  ;;  %vm617_vm3 = vcmp.eq.s32.totalorder %v1283_v51, %v289_v6 }
  0x6f   : > { %721 = vmatpush.msra.mxu1 %v683_v8  ;;  %v666_v11 = vadd.f32 %v634_v30, %v568_v9  ;;  %v388_v12 = vsel %vm355_vm0, %v1273_v47, 0.0  ;;  %v454_v17 = vsel %vm421_vm1, %v1281_v50, 0.0  ;;  %v552_v18 = vsel %vm519_vm2, %v1287_v53, 0.0 }
  0x70   : > { %v486_v19 = vadd.f32 %v454_v17, %v388_v12  ;;  %v650_v41 = vsel %vm617_vm3, %v1292_v55, 0.0  ;;  %vm338_vm4 = vcmp.eq.s32.totalorder %v1259_v40, %v272_v7  ;;  %vm404_vm5 = vcmp.eq.s32.totalorder %v1269_v45, %v272_v7 }
  0x71   : > { %702 = vmatpush.msra.mxu0 %v666_v11  ;;  %v371_v20 = vsel %vm338_vm4, %v1273_v47, 0.0  ;;  %v437_v21 = vsel %vm404_vm5, %v1281_v50, 0.0  ;;  %vm502_vm6 = vcmp.eq.s32.totalorder %v1275_v48, %v272_v7  ;;  %vm600_vm7 = vcmp.eq.s32.totalorder %v1283_v51, %v272_v7 }
  0x72   : > { %v584_v22 = vadd.f32 %v552_v18, %v486_v19  ;;  %v469_v24 = vadd.f32 %v437_v21, %v371_v20  ;;  %v535_v25 = vsel %vm502_vm6, %v1287_v53, 0.0  ;;  %v633_v13 = vsel %vm600_vm7, %v1292_v55, 0.0 }
  0x73   : > { %vm354_vm8 = vcmp.eq.s32.totalorder %v1259_v40, %v288_v10  ;;  %vm420_vm9 = vcmp.eq.s32.totalorder %v1269_v45, %v288_v10  ;;  %vm518_vm10 = vcmp.eq.s32.totalorder %v1275_v48, %v288_v10  ;;  %vm616_vm11 = vcmp.eq.s32.totalorder %v1283_v51, %v288_v10 }
  0x74   : > { %v682_v26 = vadd.f32 %v650_v41, %v584_v22  ;;  %v567_v27 = vadd.f32 %v535_v25, %v469_v24  ;;  %v387_v28 = vsel %vm354_vm8, %v1273_v47, 0.0  ;;  %v453_v29 = vsel %vm420_vm9, %v1281_v50, 0.0 }
  0x75   : > { %v485_v42 = vadd.f32 %v453_v29, %v387_v28  ;;  %v551_v32 = vsel %vm518_vm10, %v1287_v53, 0.0  ;;  %v649_v33 = vsel %vm616_vm11, %v1292_v55, 0.0  ;;  %vm337_vm12 = vcmp.eq.s32.totalorder %v1259_v40, %v271_v31 }
  0x76   : > { %722 = vmatpush.msra.mxu1 %v682_v26  ;;  %v665_v34 = vadd.f32 %v633_v13, %v567_v27  ;;  %v370_v14 = vsel %vm337_vm12, %v1273_v47, 0.0  ;;  %vm403_vm13 = vcmp.eq.s32.totalorder %v1269_v45, %v271_v31  ;;  %vm501_vm14 = vcmp.eq.s32.totalorder %v1275_v48, %v271_v31 }
  0x77   : > { %v583_v35 = vadd.f32 %v551_v32, %v485_v42  ;;  %v436_v36 = vsel %vm403_vm13, %v1281_v50, 0.0  ;;  %v534_v37 = vsel %vm501_vm14, %v1287_v53, 0.0  ;;  %vm599_vm15 = vcmp.eq.s32.totalorder %v1283_v51, %v271_v31 }
  0x78   : > { %703 = vmatpush.msra.mxu0 %v665_v34  ;;  %v468_v38 = vadd.f32 %v436_v36, %v370_v14  ;;  %v632_v39 = vsel %vm599_vm15, %v1292_v55, 0.0  ;;  %v287_v15 = vadd.s32 168, %v1213_v5  ;;  %v270_v43 = vadd.s32 32, %v1213_v5 }
  0x79   : > { %v681_v44 = vadd.f32 %v649_v33, %v583_v35  ;;  %v286_v46 = vadd.s32 160, %v1213_v5  ;;  %v269_v49 = vadd.s32 24, %v1213_v5  ;;  %v285_v52 = vadd.s32 152, %v1213_v5 }
  0x7a   : > { %v566_v16 = vadd.f32 %v534_v37, %v468_v38  ;;  %vm353_vm0 = vcmp.eq.s32.totalorder %v1259_v40, %v287_v15  ;;  %vm419_vm1 = vcmp.eq.s32.totalorder %v1269_v45, %v287_v15  ;;  %vm517_vm2 = vcmp.eq.s32.totalorder %v1275_v48, %v287_v15 }
  0x7b   : > { %723 = vmatpush.msra.mxu1 %v681_v44  ;;  %v386_v54 = vsel %vm353_vm0, %v1273_v47, 0.0  ;;  %v452_v56 = vsel %vm419_vm1, %v1281_v50, 0.0  ;;  %v550_v57 = vsel %vm517_vm2, %v1287_v53, 0.0  ;;  %vm615_vm3 = vcmp.eq.s32.totalorder %v1283_v51, %v287_v15 }
  0x7c   : > { %v664_v58 = vadd.f32 %v632_v39, %v566_v16  ;;  %v484_v59 = vadd.f32 %v452_v56, %v386_v54  ;;  %v648_v60 = vsel %vm615_vm3, %v1292_v55, 0.0  ;;  %vm336_vm4 = vcmp.eq.s32.totalorder %v1259_v40, %v270_v43 }
  0x7d   : > { %v369_v61 = vsel %vm336_vm4, %v1273_v47, 0.0  ;;  %vm402_vm5 = vcmp.eq.s32.totalorder %v1269_v45, %v270_v43  ;;  %vm500_vm6 = vcmp.eq.s32.totalorder %v1275_v48, %v270_v43  ;;  %vm598_vm7 = vcmp.eq.s32.totalorder %v1283_v51, %v270_v43 }
  0x7e   : > { %704 = vmatpush.msra.mxu0 %v664_v58  ;;  %v582_v23 = vadd.f32 %v550_v57, %v484_v59  ;;  %v435_v62 = vsel %vm402_vm5, %v1281_v50, 0.0  ;;  %v533_v63 = vsel %vm500_vm6, %v1287_v53, 0.0  ;;  %v631_v0 = vsel %vm598_vm7, %v1292_v55, 0.0 }
  0x7f   : > { %v467_v1 = vadd.f32 %v435_v62, %v369_v61  ;;  %vm352_vm8 = vcmp.eq.s32.totalorder %v1259_v40, %v286_v46  ;;  %vm418_vm9 = vcmp.eq.s32.totalorder %v1269_v45, %v286_v46  ;;  %vm516_vm10 = vcmp.eq.s32.totalorder %v1275_v48, %v286_v46 }
  0x80   : > { %v680_v2 = vadd.f32 %v648_v60, %v582_v23  ;;  %v385_v3 = vsel %vm352_vm8, %v1273_v47, 0.0  ;;  %v451_v4 = vsel %vm418_vm9, %v1281_v50, 0.0  ;;  %v549_v30 = vsel %vm516_vm10, %v1287_v53, 0.0 }
  0x81   : > { %v565_v6 = vadd.f32 %v533_v63, %v467_v1  ;;  %v483_v7 = vadd.f32 %v451_v4, %v385_v3  ;;  %vm614_vm11 = vcmp.eq.s32.totalorder %v1283_v51, %v286_v46  ;;  %vm335_vm12 = vcmp.eq.s32.totalorder %v1259_v40, %v269_v49 }
  0x82   : > { %724 = vmatpush.msra.mxu1 %v680_v2  ;;  %v647_v8 = vsel %vm614_vm11, %v1292_v55, 0.0  ;;  %v368_v9 = vsel %vm335_vm12, %v1273_v47, 0.0  ;;  %vm401_vm13 = vcmp.eq.s32.totalorder %v1269_v45, %v269_v49  ;;  %vm499_vm14 = vcmp.eq.s32.totalorder %v1275_v48, %v269_v49 }
  0x83   : > { %v663_v10 = vadd.f32 %v631_v0, %v565_v6  ;;  %v581_v31 = vadd.f32 %v549_v30, %v483_v7  ;;  %v434_v11 = vsel %vm401_vm13, %v1281_v50, 0.0  ;;  %v532_v12 = vsel %vm499_vm14, %v1287_v53, 0.0 }
  0x84   : > { %v466_v17 = vadd.f32 %v434_v11, %v368_v9  ;;  %vm597_vm15 = vcmp.eq.s32.totalorder %v1283_v51, %v269_v49  ;;  %vm351_vm0 = vcmp.eq.s32.totalorder %v1259_v40, %v285_v52  ;;  %vm417_vm1 = vcmp.eq.s32.totalorder %v1269_v45, %v285_v52 }
  0x85   : > { %705 = vmatpush.msra.mxu0 %v663_v10  ;;  %v679_v18 = vadd.f32 %v647_v8, %v581_v31  ;;  %v630_v19 = vsel %vm597_vm15, %v1292_v55, 0.0  ;;  %v384_v41 = vsel %vm351_vm0, %v1273_v47, 0.0  ;;  %v450_v20 = vsel %vm417_vm1, %v1281_v50, 0.0 }
  0x86   : > { %v564_v21 = vadd.f32 %v532_v12, %v466_v17  ;;  %v482_v22 = vadd.f32 %v450_v20, %v384_v41  ;;  %vm515_vm2 = vcmp.eq.s32.totalorder %v1275_v48, %v285_v52  ;;  %vm613_vm3 = vcmp.eq.s32.totalorder %v1283_v51, %v285_v52  ;;  %v691_v12 = vld [vmem:[%s1201_s4] sm:$0xff] }
  0x87   : > { %725 = vmatpush.msra.mxu1 %v679_v18  ;;  %v548_v24 = vsel %vm515_vm2, %v1287_v53, 0.0  ;;  %v646_v25 = vsel %vm613_vm3, %v1292_v55, 0.0  ;;  %v268_v13 = vadd.s32 16, %v1213_v5  ;;  %v284_v26 = vadd.s32 144, %v1213_v5 }
  0x88   : > { %v662_v27 = vadd.f32 %v630_v19, %v564_v21  ;;  %v580_v28 = vadd.f32 %v548_v24, %v482_v22  ;;  %v267_v29 = vadd.s32 8, %v1213_v5  ;;  %v283_v42 = vadd.s32 136, %v1213_v5 }
  0x89   : > { %vm334_vm4 = vcmp.eq.s32.totalorder %v1259_v40, %v268_v13  ;;  %vm400_vm5 = vcmp.eq.s32.totalorder %v1269_v45, %v268_v13  ;;  %vm498_vm6 = vcmp.eq.s32.totalorder %v1275_v48, %v268_v13  ;;  %vm596_vm7 = vcmp.eq.s32.totalorder %v1283_v51, %v268_v13 }
  0x8a   : > { %706 = vmatpush.msra.mxu0 %v662_v27  ;;  %v678_v32 = vadd.f32 %v646_v25, %v580_v28  ;;  %v367_v33 = vsel %vm334_vm4, %v1273_v47, 0.0  ;;  %v433_v34 = vsel %vm400_vm5, %v1281_v50, 0.0  ;;  %v531_v14 = vsel %vm498_vm6, %v1287_v53, 0.0 }
  0x8b   : > { %v465_v35 = vadd.f32 %v433_v34, %v367_v33  ;;  %v629_v36 = vsel %vm596_vm7, %v1292_v55, 0.0  ;;  %vm350_vm8 = vcmp.eq.s32.totalorder %v1259_v40, %v284_v26  ;;  %vm416_vm9 = vcmp.eq.s32.totalorder %v1269_v45, %v284_v26 }
  0x8c   : > { %726 = vmatpush.msra.mxu1 %v678_v32  ;;  %v383_v37 = vsel %vm350_vm8, %v1273_v47, 0.0  ;;  %v449_v38 = vsel %vm416_vm9, %v1281_v50, 0.0  ;;  %vm514_vm10 = vcmp.eq.s32.totalorder %v1275_v48, %v284_v26  ;;  %vm612_vm11 = vcmp.eq.s32.totalorder %v1283_v51, %v284_v26 }
  0x8d   : > { %v563_v39 = vadd.f32 %v531_v14, %v465_v35  ;;  %v481_v15 = vadd.f32 %v449_v38, %v383_v37  ;;  %v547_v43 = vsel %vm514_vm10, %v1287_v53, 0.0  ;;  %v645_v44 = vsel %vm612_vm11, %v1292_v55, 0.0 }
  0x8e   : > { %vm333_vm12 = vcmp.eq.s32.totalorder %v1259_v40, %v267_v29  ;;  %vm399_vm13 = vcmp.eq.s32.totalorder %v1269_v45, %v267_v29  ;;  %vm497_vm14 = vcmp.eq.s32.totalorder %v1275_v48, %v267_v29  ;;  %vm595_vm15 = vcmp.eq.s32.totalorder %v1283_v51, %v267_v29 }
  0x8f   : > { %v661_v46 = vadd.f32 %v629_v36, %v563_v39  ;;  %v579_v49 = vadd.f32 %v547_v43, %v481_v15  ;;  %v366_v52 = vsel %vm333_vm12, %v1273_v47, 0.0  ;;  %v432_v16 = vsel %vm399_vm13, %v1281_v50, 0.0 }
  0x90   : > { %v464_v54 = vadd.f32 %v432_v16, %v366_v52  ;;  %v530_v56 = vsel %vm497_vm14, %v1287_v53, 0.0  ;;  %v628_v57 = vsel %vm595_vm15, %v1292_v55, 0.0  ;;  %vm349_vm0 = vcmp.eq.s32.totalorder %v1259_v40, %v283_v42 }
  0x91   : > { %707 = vmatpush.msra.mxu0 %v661_v46  ;;  %v677_v58 = vadd.f32 %v645_v44, %v579_v49  ;;  %v382_v59 = vsel %vm349_vm0, %v1273_v47, 0.0  ;;  %vm415_vm1 = vcmp.eq.s32.totalorder %v1269_v45, %v283_v42  ;;  %vm513_vm2 = vcmp.eq.s32.totalorder %v1275_v48, %v283_v42 }
  0x92   : > { %v562_v60 = vadd.f32 %v530_v56, %v464_v54  ;;  %v448_v61 = vsel %vm415_vm1, %v1281_v50, 0.0  ;;  %v546_v23 = vsel %vm513_vm2, %v1287_v53, 0.0  ;;  %vm611_vm3 = vcmp.eq.s32.totalorder %v1283_v51, %v283_v42 }
  0x93   : > { %727 = vmatpush.msra.mxu1 %v677_v58  ;;  %v480_v62 = vadd.f32 %v448_v61, %v382_v59  ;;  %v644_v63 = vsel %vm611_vm3, %v1292_v55, 0.0  ;;  %vm332_vm4 = vcmp.eq.s32.totalorder %v1259_v40, %v1213_v5  ;;  %vm398_vm5 = vcmp.eq.s32.totalorder %v1269_v45, %v1213_v5 }
  0x94   : > { %v660_v0 = vadd.f32 %v628_v57, %v562_v60  ;;  %v365_v1 = vsel %vm332_vm4, %v1273_v47, 0.0  ;;  %v431_v2 = vsel %vm398_vm5, %v1281_v50, 0.0  ;;  %vm496_vm6 = vcmp.eq.s32.totalorder %v1275_v48, %v1213_v5 }
  0x95   : > { %v578_v3 = vadd.f32 %v546_v23, %v480_v62  ;;  %v463_v4 = vadd.f32 %v431_v2, %v365_v1  ;;  %v529_v30 = vsel %vm496_vm6, %v1287_v53, 0.0  ;;  %vm594_vm7 = vcmp.eq.s32.totalorder %v1283_v51, %v1213_v5 }
  0x96   : > { %708 = vmatpush.msra.mxu0 %v660_v0  ;;  %v627_v6 = vsel %vm594_vm7, %v1292_v55, 0.0  ;;  %v282_v7 = vadd.s32 128, %v1213_v5 }
  0x97   : > { %v676_v8 = vadd.f32 %v644_v63, %v578_v3  ;;  %v561_v9 = vadd.f32 %v529_v30, %v463_v4 }
  0x98   : > { %vm348_vm8 = vcmp.eq.s32.totalorder %v1259_v40, %v282_v7  ;;  %vm414_vm9 = vcmp.eq.s32.totalorder %v1269_v45, %v282_v7  ;;  %vm512_vm10 = vcmp.eq.s32.totalorder %v1275_v48, %v282_v7  ;;  %vm610_vm11 = vcmp.eq.s32.totalorder %v1283_v51, %v282_v7  ;;  %v692_v51 = vld [vmem:[%s1201_s4 + $0x8] sm:$0xff] }
  0x99   : > { %728 = vmatpush.msra.mxu1 %v676_v8  ;;  %v659_v10 = vadd.f32 %v627_v6, %v561_v9  ;;  %v381_v31 = vsel %vm348_vm8, %v1273_v47, 0.0  ;;  %v447_v11 = vsel %vm414_vm9, %v1281_v50, 0.0  ;;  %v545_v5 = vsel %vm512_vm10, %v1287_v53, 0.0 }
  0x9a   : > { %v479_v17 = vadd.f32 %v447_v11, %v381_v31  ;;  %v643_v40 = vsel %vm610_vm11, %v1292_v55, 0.0 }
  0x9b   : > { %709 = vmatpush.msra.mxu0 %v659_v10 }
  0x9c   : > { %v577_v45 = vadd.f32 %v545_v5, %v479_v17  ;;  %710 = vmatmul.f32.vlgmr.msra.gmra.mxu0 %v691_v12 }
  0x9e   : > { %v675_v48 = vadd.f32 %v643_v40, %v577_v45 }
  0xa0   : > { %729 = vmatpush.msra.mxu1 %v675_v48 }
  0xa1   : > { %730 = vmatmul.f32.vlgmr.msra.gmra.mxu1 %v692_v51 }
 0x119   : > { %v711_v47 = vpop.f32.mrf.mxu0 }
 0x11e   : > { %v731_v50 = vpop.f32.mrf.mxu1 }
 0x11f   : > { %v732_v53 = vadd.f32 %v731_v50, %v711_v47 }
 0x121   : > { %737 = vst [vmem:[%s217_s18] sm:$0xff] %v732_v53 }
 0x122   : > { %1034 = shalt.err (!%p1031_p13)
}
 0x123   : > { %883 = dma.vmem_to_hbm [thread:$0]  (%p1162_p9), %s753_s20, 128, %s755_s26, %s739_s19  }
 0x124 PF: > { %s766_s29 = sand.u32 1, %s1073_s9   ;;  %p893_p0 = pnand %p861_p12, %p1169_p11 }
 0x125   : > { %s767_s5 = scalar_lea.sflag [#allocation5], %s766_s29 }
 0x126   : > { %p894_p1 = pneg %p893_p0 }
 0x128   : > { %1068 = dma.done.wait (%p894_p1), %s767_s5, 128  }
 0x129   : > { %1070 = vsyncadd (%p894_p1), %s767_s5, 4294967168  ;;  %s21_s14 = sadd.s32 1, %s1093_s14   ;;  %s1667_s9 = smov %s1077_s10 }
 0x12a   : > { %p18_p2 = scmp.ge.s32.totalorder %s21_s14, 4   ;;  %s1668_s10 = smov %s1081_s11 }
 0x12b   : > { %s1669_s11 = smov %s1167_s23  ;;  %s1670_s12 = smov %s1089_s13 }
 0x12c   : > { %s1671_s13 = smov %s1673_s17  ;;  %20 = sbr.rel (!%p18_p2) target bundleno = 8 (0x8), region = 86 }
 0x131   :  { %773 = vsyncpa [#allocation4], 1 }
 0x132   :  { %775 = vsyncpa [#allocation4 + $0x1], 1 }
 0x133   :  { %776 = vsyncpa [#allocation7], 1 }
 0x134   :  { %778 = vsyncpa [#allocation7 + $0x1], 1 }
 0x135   :  { %779 = vsyncpa [#allocation5], 1 }
 0x136   :  { %781 = vsyncpa [#allocation5 + $0x1], 1 }

</bundles_post_ra>
